<compile_context>
chip_gen: v5e
topology: v5e:2x2
jax: 0.10.0
libtpu: 0.0.40
codegen_flags: <defaults>
</compile_context>

<pallas_src>
import jax
import jax.numpy as jnp
import numpy as np
from jax.experimental import pallas as pl
from jax.experimental.pallas import tpu as pltpu


def _round_up(x, m):
    return ((x + m - 1) // m) * m


def embed_concat_kernel(embed_ref, mask_ref, w1_ref, b1_ref, w2_ref, b2_ref,
                        logits_ref, acc_ref, cnt_ref):
    """One (batch-tile, seq-tile) grid step.

    Axis 0 (batch tiles) is 'parallel'; axis 1 (sequence tiles) is the
    'arbitrary' reduction axis.  acc/cnt are VMEM scratch accumulators that
    persist across the sequence axis; the output head runs once per batch
    tile on the last sequence step.
    """
    si = pl.program_id(1)

    @pl.when(si == 0)
    def _init():
        acc_ref[...] = jnp.zeros_like(acc_ref)
        cnt_ref[...] = jnp.zeros_like(cnt_ref)

    # ---- masked-sum pooling, fused per sequence tile.  Accumulate in f32
    #      even if the embeddings stream in as bf16. ----
    embed = embed_ref[...].astype(jnp.float32)                 # (bt, st, H)
    mask = mask_ref[...].astype(jnp.float32)                   # (bt, st)
    acc_ref[...] += jnp.sum(embed * mask[:, :, None], axis=1)  # (bt, H)
    cnt_ref[...] += jnp.sum(mask, axis=1, keepdims=True)       # (bt, 1)

    @pl.when(si == pl.num_programs(1) - 1)
    def _finalize():
        # Clamp guards fully-masked (or batch-padded) rows against div-by-0.
        denom = jnp.maximum(cnt_ref[...], 1.0)
        pooled = acc_ref[...] * pl.reciprocal(denom, approx=True)  # EUP recip

        # Output head: Linear(H,H) -> SiLU -> Linear(H,1).
        h = jnp.dot(pooled, w1_ref[...],
                    preferred_element_type=jnp.float32) + b1_ref[...]
        h = h * jax.nn.sigmoid(h)                                   # SiLU
        # Second linear has N=1: lane-wide multiply + reduce on VPU/XLU
        # instead of an (H,1) matmul with a pathological layout.
        logits = jnp.sum(h * w2_ref[...], axis=-1, keepdims=True) + b2_ref[0]
        # Lane-dense store: fill the whole 128-lane slab (wrapper slices col 0).
        logits_ref[...] = jnp.broadcast_to(logits, logits_ref.shape)


def embed_concat_forward(concat_embed, concat_mask, w1, b1, w2, b2, labels=None,
                         *, b_tile=8, vmem_working_budget=24 * 1024 * 1024):
    """Masked-mean pooling over the concatenated sequence + output head + MSE.

    concat_embed: (B, S, H) f32 or bf16
    concat_mask:  (B, S)
    w1: (H, H)   b1: (H,)/(1,H)   w2: (H, 1)   b2: (1,)/(1,1)
    labels: (B, 1) or None
    """
    B, S, H = concat_embed.shape
    esize = jnp.dtype(concat_embed.dtype).itemsize

    # ---- batch tile: multiple of 8 (sublane-friendly) unless B is small. ----
    if B > b_tile:
        bt = b_tile
        B_pad = _round_up(B, bt)
    else:
        bt, B_pad = B, B                 # single batch tile, full dim is legal

    # ---- sequence tile: largest multiple of 128 whose in-kernel working set
    #      (double-buffered input tile + ~3 f32 temporaries for the fused
    #      masked-sum) fits the budget.  Each DMA stays multi-MiB, so the
    #      kernel rides the HBM roofline on all chip generations. ----
    bytes_per_s = bt * H * (2 * esize + 3 * 4)
    s_tile = (vmem_working_budget // max(bytes_per_s, 1)) // 128 * 128
    s_tile = int(max(128, min(2048, s_tile)))
    if S > s_tile:
        st = s_tile
        S_pad = _round_up(S, st)
    else:
        st, S_pad = S, S                 # single reduction step, full dim

    emb = concat_embed
    msk = concat_mask.astype(jnp.float32)
    if B_pad != B or S_pad != S:
        # Zero-padded rows/positions contribute nothing to the masked sum or
        # the mask count, and padded batch rows are sliced off below.
        emb = jnp.pad(emb, ((0, B_pad - B), (0, S_pad - S), (0, 0)))
        msk = jnp.pad(msk, ((0, B_pad - B), (0, S_pad - S)))

    w1 = w1.astype(jnp.float32)
    b1 = jnp.reshape(b1, (1, H)).astype(jnp.float32)
    w2_row = jnp.reshape(w2, (1, H)).astype(jnp.float32)   # (H,1) -> (1,H)
    b2_s = jnp.reshape(b2, (1,)).astype(jnp.float32)       # scalar -> SMEM

    grid = (B_pad // bt, S_pad // st)

    logits_padded = pl.pallas_call(
        embed_concat_kernel,
        out_shape=jax.ShapeDtypeStruct((B_pad, 128), jnp.float32),
        grid=grid,
        in_specs=[
            pl.BlockSpec((bt, st, H), lambda bi, si: (bi, si, 0)),  # embeddings
            pl.BlockSpec((bt, st), lambda bi, si: (bi, si)),        # attn mask
            pl.BlockSpec((H, H), lambda bi, si: (0, 0)),            # w1 (resident)
            pl.BlockSpec((1, H), lambda bi, si: (0, 0)),            # b1 (resident)
            pl.BlockSpec((1, H), lambda bi, si: (0, 0)),            # w2 row (resident)
            pl.BlockSpec(memory_space=pltpu.MemorySpace.SMEM),      # b2 scalar
        ],
        out_specs=pl.BlockSpec((bt, 128), lambda bi, si: (bi, 0)),
        scratch_shapes=[
            pltpu.VMEM((bt, H), jnp.float32),   # masked-sum accumulator
            pltpu.VMEM((bt, 1), jnp.float32),   # mask-count accumulator
        ],
        compiler_params=pltpu.CompilerParams(
            dimension_semantics=("parallel", "arbitrary"),
            vmem_limit_bytes=48 * 1024 * 1024),
    )(emb, msk, w1, b1, w2_row, b2_s)

    logits = logits_padded[:B, :1]                          # (B, 1)

    loss = None
    if labels is not None:
        # MSE (reduction='mean'): a tiny (B,) reduction, done wrapper-side so
        # the kernel keeps lane-dense stores and no scalar sits in VMEM.
        loss = jnp.mean((logits - labels) ** 2)
    return {"logits": logits, "loss": loss}


if __name__ == "__main__":
    key = jax.random.PRNGKey(0)
    B, L_LIG, L_REC, H, VOCAB = 2, 8, 8, 32, 64
    k1, k2, k3, k4, k5, k6 = jax.random.split(key, 6)

    # token ids + attention masks (inputs)
    ligand_ids = jax.random.randint(k1, (B, L_LIG), 0, VOCAB)
    receptor_ids = jax.random.randint(k2, (B, L_REC), 0, VOCAB)
    ligand_mask = jnp.ones((B, L_LIG), jnp.int32).at[:, L_LIG - 2:].set(0)
    receptor_mask = jnp.ones((B, L_REC), jnp.int32).at[:, L_REC - 3:].set(0)

    # TODO(synk): the real HF transformer backbone has no in-kernel
    # equivalent; a deterministic token-embedding lookup stands in for it.
    embed_table = jax.random.normal(k3, (VOCAB, H), jnp.float32) * 0.02
    ligand_embed = embed_table[ligand_ids]
    receptor_embed = embed_table[receptor_ids]

    # concat_first=True: concatenate along the sequence dimension (dim=1).
    concat_embed = jnp.concatenate([ligand_embed, receptor_embed], axis=1)
    concat_mask = jnp.concatenate(
        [ligand_mask, receptor_mask], axis=1).astype(jnp.float32)

    # output head, init per reset_parameters(): uniform(-0.1, 0.1), zero bias
    INITRANGE = 0.1
    w1 = jax.random.uniform(k4, (H, H), jnp.float32, -INITRANGE, INITRANGE)
    b1 = jnp.zeros((H,), jnp.float32)
    w2 = jax.random.uniform(k5, (H, 1), jnp.float32, -INITRANGE, INITRANGE)
    b2 = jnp.zeros((1,), jnp.float32)
    labels = jax.random.normal(k6, (B, 1), jnp.float32)

    out = embed_concat_forward(
        concat_embed, concat_mask, w1, b1, w2, b2, labels)
    jax.block_until_ready(out)
    logits, loss = out["logits"], out["loss"]

    # Pure-JAX reference (exact division; kernel uses approx reciprocal).
    masked = concat_embed * concat_mask[:, :, None]
    denom_ref = jnp.maximum(jnp.sum(concat_mask, axis=1, keepdims=True), 1.0)
    pooled_ref = jnp.sum(masked, axis=1) / denom_ref
    h_ref = pooled_ref @ w1 + b1[None, :]
    h_ref = h_ref * jax.nn.sigmoid(h_ref)
    logits_ref = h_ref @ w2 + b2[None, :]
    loss_ref = jnp.mean((logits_ref - labels) ** 2)

    assert logits.shape == (B, 1)
    np.testing.assert_allclose(np.asarray(logits), np.asarray(logits_ref),
                               rtol=2e-2, atol=2e-3)
    np.testing.assert_allclose(float(loss), float(loss_ref),
                               rtol=2e-2, atol=2e-3)
    print("KERNEL_OK")
</pallas_src>

<mosaic_0001>
module attributes {stable_mosaic.version = 11 : i64} {
  func.func @embed_concat_kernel(%arg0: i32, %arg1: i32, %arg2: memref<2x16x32xf32, #tpu.memory_space<vmem>>, %arg3: memref<2x16xf32, #tpu.memory_space<vmem>>, %arg4: memref<32x32xf32, #tpu.memory_space<vmem>>, %arg5: memref<1x32xf32, #tpu.memory_space<vmem>>, %arg6: memref<1x32xf32, #tpu.memory_space<vmem>>, %arg7: memref<1xf32, #tpu.memory_space<smem>>, %arg8: memref<2x128xf32, #tpu.memory_space<vmem>>, %arg9: memref<2x32xf32, #tpu.memory_space<vmem>>, %arg10: memref<2x1xf32, #tpu.memory_space<vmem>>) attributes {dimension_semantics = [#tpu.dimension_semantics<parallel>, #tpu.dimension_semantics<arbitrary>], iteration_bounds = array<i64: 1, 1>, scalar_prefetch = 0 : i64, scratch_operands = 2 : i64, tpu.core_type = #tpu.core_type<tc>, window_params = [{transform_indices = @transform_0, window_bounds = array<i64: 2, 16, 32>}, {transform_indices = @transform_1, window_bounds = array<i64: 2, 16>}, {pipeline_mode = #tpu.pipeline_mode<synchronous>, transform_indices = @transform_2, window_bounds = array<i64: 32, 32>}, {pipeline_mode = #tpu.pipeline_mode<synchronous>, transform_indices = @transform_3, window_bounds = array<i64: 1, 32>}, {pipeline_mode = #tpu.pipeline_mode<synchronous>, transform_indices = @transform_4, window_bounds = array<i64: 1, 32>}, {transform_indices = @transform_5, window_bounds = array<i64: 1>}, {transform_indices = @transform_6, window_bounds = array<i64: 2, 128>}]} {
    %c0_i32 = arith.constant 0 : i32
    %0 = arith.cmpi eq, %arg1, %c0_i32 : i32
    %1 = arith.extui %0 : i1 to i32
    %c0_i32_0 = arith.constant 0 : i32
    %2 = arith.cmpi ne, %1, %c0_i32_0 : i32
    scf.if %2 {
      %cst_16 = arith.constant 0.000000e+00 : f32
      %20 = vector.broadcast %cst_16 : f32 to vector<2x32xf32>
      %c0_17 = arith.constant 0 : index
      %c0_18 = arith.constant 0 : index
      %21 = vector.load %arg9[%c0_17, %c0_18] : memref<2x32xf32, #tpu.memory_space<vmem>>, vector<2x32xf32>
      tpu.vector_store %arg9[%c0_17, %c0_18], %20 {strides = array<i32>} : memref<2x32xf32, #tpu.memory_space<vmem>>, vector<2x32xf32>,
      %cst_19 = arith.constant 0.000000e+00 : f32
      %22 = vector.broadcast %cst_19 : f32 to vector<2x1xf32>
      %c0_20 = arith.constant 0 : index
      %c0_21 = arith.constant 0 : index
      %23 = vector.load %arg10[%c0_20, %c0_21] : memref<2x1xf32, #tpu.memory_space<vmem>>, vector<2x1xf32>
      tpu.vector_store %arg10[%c0_20, %c0_21], %22 {strides = array<i32>} : memref<2x1xf32, #tpu.memory_space<vmem>>, vector<2x1xf32>,
    } else {
    }
    %c0 = arith.constant 0 : index
    %c0_1 = arith.constant 0 : index
    %c0_2 = arith.constant 0 : index
    %3 = vector.load %arg2[%c0, %c0_1, %c0_2] : memref<2x16x32xf32, #tpu.memory_space<vmem>>, vector<2x16x32xf32>
    %c0_3 = arith.constant 0 : index
    %c0_4 = arith.constant 0 : index
    %4 = vector.load %arg3[%c0_3, %c0_4] : memref<2x16xf32, #tpu.memory_space<vmem>>, vector<2x16xf32>
    %c0_5 = arith.constant 0 : index
    %c0_6 = arith.constant 0 : index
    %5 = vector.load %arg9[%c0_5, %c0_6] : memref<2x32xf32, #tpu.memory_space<vmem>>, vector<2x32xf32>
    %6 = vector.shape_cast %4 : vector<2x16xf32> to vector<2x16x1xf32>
    %7 = vector.broadcast %6 : vector<2x16x1xf32> to vector<2x16x32xf32>
    %8 = arith.mulf %3, %7 : vector<2x16x32xf32>
    %cst = arith.constant dense<0.000000e+00> : vector<2x32xf32>
    %9 = vector.multi_reduction <add>, %8, %cst [1] : vector<2x16x32xf32> to vector<2x32xf32>
    %10 = arith.addf %5, %9 : vector<2x32xf32>
    %c0_7 = arith.constant 0 : index
    %c0_8 = arith.constant 0 : index
    %11 = vector.load %arg9[%c0_7, %c0_8] : memref<2x32xf32, #tpu.memory_space<vmem>>, vector<2x32xf32>
    tpu.vector_store %arg9[%c0_7, %c0_8], %10 {strides = array<i32>} : memref<2x32xf32, #tpu.memory_space<vmem>>, vector<2x32xf32>,
    %c0_9 = arith.constant 0 : index
    %c0_10 = arith.constant 0 : index
    %12 = vector.load %arg10[%c0_9, %c0_10] : memref<2x1xf32, #tpu.memory_space<vmem>>, vector<2x1xf32>
    %cst_11 = arith.constant dense<0.000000e+00> : vector<2xf32>
    %13 = vector.multi_reduction <add>, %4, %cst_11 [1] : vector<2x16xf32> to vector<2xf32>
    %14 = vector.shape_cast %13 : vector<2xf32> to vector<2x1xf32>
    %15 = arith.addf %12, %14 : vector<2x1xf32>
    %c0_12 = arith.constant 0 : index
    %c0_13 = arith.constant 0 : index
    %16 = vector.load %arg10[%c0_12, %c0_13] : memref<2x1xf32, #tpu.memory_space<vmem>>, vector<2x1xf32>
    tpu.vector_store %arg10[%c0_12, %c0_13], %15 {strides = array<i32>} : memref<2x1xf32, #tpu.memory_space<vmem>>, vector<2x1xf32>,
    %c0_i32_14 = arith.constant 0 : i32
    %17 = arith.cmpi eq, %arg1, %c0_i32_14 : i32
    %18 = arith.extui %17 : i1 to i32
    %c0_i32_15 = arith.constant 0 : i32
    %19 = arith.cmpi ne, %18, %c0_i32_15 : i32
    scf.if %19 {
      %c0_16 = arith.constant 0 : index
      %c0_17 = arith.constant 0 : index
      %20 = vector.load %arg10[%c0_16, %c0_17] : memref<2x1xf32, #tpu.memory_space<vmem>>, vector<2x1xf32>
      %cst_18 = arith.constant 1.000000e+00 : f32
      %21 = vector.broadcast %cst_18 : f32 to vector<2x1xf32>
      %22 = arith.maximumf %20, %21 : vector<2x1xf32>
      %c0_19 = arith.constant 0 : index
      %c0_20 = arith.constant 0 : index
      %23 = vector.load %arg9[%c0_19, %c0_20] : memref<2x32xf32, #tpu.memory_space<vmem>>, vector<2x32xf32>
      %24 = tpu.reciprocal %22 {approx = true} : vector<2x1xf32> -> vector<2x1xf32>
      %25 = vector.broadcast %24 : vector<2x1xf32> to vector<2x32xf32>
      %26 = arith.mulf %23, %25 : vector<2x32xf32>
      %c0_21 = arith.constant 0 : index
      %c0_22 = arith.constant 0 : index
      %27 = vector.load %arg4[%c0_21, %c0_22] : memref<32x32xf32, #tpu.memory_space<vmem>>, vector<32x32xf32>
      %cst_23 = arith.constant dense<0.000000e+00> : vector<2x32xf32>
      %28 = tpu.matmul %26, %27, %cst_23 {dimension_numbers = #tpu.dot_dimension_numbers<[1], [0], [0], [1], [0, 0, 1, 1], [], []>} : vector<2x32xf32>, vector<32x32xf32>, vector<2x32xf32> -> vector<2x32xf32>
      %c0_24 = arith.constant 0 : index
      %c0_25 = arith.constant 0 : index
      %29 = vector.load %arg5[%c0_24, %c0_25] : memref<1x32xf32, #tpu.memory_space<vmem>>, vector<1x32xf32>
      %30 = vector.broadcast %29 : vector<1x32xf32> to vector<2x32xf32>
      %31 = arith.addf %28, %30 : vector<2x32xf32>
      %32 = arith.negf %31 : vector<2x32xf32>
      %33 = math.exp %32 : vector<2x32xf32>
      %cst_26 = arith.constant 1.000000e+00 : f32
      %34 = vector.broadcast %cst_26 : f32 to vector<2x32xf32>
      %35 = arith.addf %34, %33 : vector<2x32xf32>
      %36 = arith.divf %34, %35 : vector<2x32xf32>
      %37 = arith.mulf %31, %36 : vector<2x32xf32>
      %c0_27 = arith.constant 0 : index
      %c0_28 = arith.constant 0 : index
      %38 = vector.load %arg6[%c0_27, %c0_28] : memref<1x32xf32, #tpu.memory_space<vmem>>, vector<1x32xf32>
      %39 = vector.broadcast %38 : vector<1x32xf32> to vector<2x32xf32>
      %40 = arith.mulf %37, %39 : vector<2x32xf32>
      %cst_29 = arith.constant dense<0.000000e+00> : vector<2xf32>
      %41 = vector.multi_reduction <add>, %40, %cst_29 [1] : vector<2x32xf32> to vector<2xf32>
      %42 = vector.shape_cast %41 : vector<2xf32> to vector<2x1xf32>
      %c0_30 = arith.constant 0 : index
      %43 = memref.load %arg7[%c0_30] : memref<1xf32, #tpu.memory_space<smem>>
      %44 = vector.broadcast %43 : f32 to vector<2x1xf32>
      %45 = arith.addf %42, %44 : vector<2x1xf32>
      %46 = vector.shape_cast %45 : vector<2x1xf32> to vector<2x1xf32>
      %47 = vector.broadcast %46 : vector<2x1xf32> to vector<2x128xf32>
      %c0_31 = arith.constant 0 : index
      %c0_32 = arith.constant 0 : index
      %48 = vector.load %arg8[%c0_31, %c0_32] : memref<2x128xf32, #tpu.memory_space<vmem>>, vector<2x128xf32>
      tpu.vector_store %arg8[%c0_31, %c0_32], %47 {strides = array<i32>} : memref<2x128xf32, #tpu.memory_space<vmem>>, vector<2x128xf32>,
    } else {
    }
    return
  }
  func.func @transform_0(%arg0: i32, %arg1: i32) -> (i32, i32, i32) {
    %c0_i32 = arith.constant 0 : i32
    %c0_i32_0 = arith.constant 0 : i32
    return %arg0, %arg1, %c0_i32 : i32, i32, i32
  }
  func.func @transform_1(%arg0: i32, %arg1: i32) -> (i32, i32) {
    %c0_i32 = arith.constant 0 : i32
    return %arg0, %arg1 : i32, i32
  }
  func.func @transform_2(%arg0: i32, %arg1: i32) -> (i32, i32) {
    %c0_i32 = arith.constant 0 : i32
    %c0_i32_0 = arith.constant 0 : i32
    %c0_i32_1 = arith.constant 0 : i32
    return %c0_i32, %c0_i32_0 : i32, i32
  }
  func.func @transform_3(%arg0: i32, %arg1: i32) -> (i32, i32) {
    %c0_i32 = arith.constant 0 : i32
    %c0_i32_0 = arith.constant 0 : i32
    %c0_i32_1 = arith.constant 0 : i32
    return %c0_i32, %c0_i32_0 : i32, i32
  }
  func.func @transform_4(%arg0: i32, %arg1: i32) -> (i32, i32) {
    %c0_i32 = arith.constant 0 : i32
    %c0_i32_0 = arith.constant 0 : i32
    %c0_i32_1 = arith.constant 0 : i32
    return %c0_i32, %c0_i32_0 : i32, i32
  }
  func.func @transform_5(%arg0: i32, %arg1: i32) -> i32 {
    %c0_i32 = arith.constant 0 : i32
    %c0_i32_0 = arith.constant 0 : i32
    return %c0_i32 : i32
  }
  func.func @transform_6(%arg0: i32, %arg1: i32) -> (i32, i32) {
    %c0_i32 = arith.constant 0 : i32
    %c0_i32_0 = arith.constant 0 : i32
    return %arg0, %c0_i32 : i32, i32
  }
}

</mosaic_0001>

<bundles_post_ra>
// kernel: tpu_custom_call.1
= control target key start
LH: loop header
LB: loop body
LE: loop exit
PB: predicated region body
PF: predicated region fallthrough
CT: control target
= control target key end

     0   :  { %12 = vsyncpa [#allocation6], 0  ;;  %s404_s0 = inlined_call_operand.hbm [shape: f32[2,16,32], index: 0, kind: input, shape index: {}]   ;;  %s405_s1 = inlined_call_operand.vmem [shape: f32[2,16], index: 1, kind: input, shape index: {}]   ;;  %s406_s2 = inlined_call_operand.hbm [shape: f32[32,32], index: 2, kind: input, shape index: {}]   ;;  %s407_s3 = inlined_call_operand.vmem [shape: f32[1,32], index: 3, kind: input, shape index: {}]   ;;  %s408_s4 = inlined_call_operand.vmem [shape: f32[1,32], index: 4, kind: input, shape index: {}]   ;;  %s409_s5 = inlined_call_operand.<no memory space> [shape: f32[1], index: 5, kind: input, shape index: {}]   ;;  %s410_s6 = inlined_call_operand.hbm [shape: f32[2,128], index: 6, kind: output, shape index: {}]  }
   0x1   :  { %13 = vsyncpa [#allocation9], 0 }
   0x2   :  { %14 = vsyncpa [#allocation7], 0  ;;  %s19_s23 = sshll.u32 %s404_s0, 4  ;;  %s331_s24 = smov [#allocation5]   ;;  %s20_s23 = int_to_ptr.hbm [resolvable:$true] %s19_s23 }
   0x3   :  { %s21_s25 = sshll.u32 %s331_s24, 4  ;;  %s34_s28 = sshll.u32 %s406_s2, 4  ;;  %s22_s25 = int_to_ptr.vmem [resolvable:$true] %s21_s25  ;;  %s35_s28 = int_to_ptr.hbm [resolvable:$true] %s34_s28 }
   0x4   :  { %s332_s29 = smov 128   ;;  %s333_s30 = smov 8  }
   0x5   :  { %27 = dma.hbm_to_vmem [thread:$0]  %s20_s23, 512, %s22_s25, [#allocation6], %s332_s29, %s332_s29, %s333_s30  }
   0x6   :  { %s334_s7 = smov [#allocation8]  }
   0x7   :  { %s36_s8 = sshll.u32 %s334_s7, 4  ;;  %s37_s8 = int_to_ptr.vmem [resolvable:$true] %s36_s8 }
   0x8   :  { %42 = dma.hbm_to_vmem [thread:$0]  %s35_s28, 512, %s37_s8, [#allocation9], %s332_s29, %s332_s29, %s333_s30  }
   0x9   :  { %325 = dma.done.wait [#allocation6], 512  }
   0xa   :  { %326 = vsyncadd [#allocation6], 4294966784 }
   0xb   :  { %327 = dma.done.wait [#allocation9], 512  }
   0xc   :  { %328 = vsyncadd [#allocation9], 4294966784  ;;  %v72_v0 = vlaneseq  ;;  %vm61_vm0 = vcmask 254976   ;;  %vm63_vm1 = vcmask 1024   ;;  %v335_v1 = vmov 0.0   ;;  %v152_v12 = vld [vmem:[#allocation8 + $0x18] sm:$0xff] }
   0xd   :  { %62 = vst.msk [vmem:[#allocation2] sm:$0x3] %vm61_vm0, %v335_v1  ;;  %vm129_vm2 = vcmask 123904   ;;  %v69_v4 = vld [vmem:[%s405_s1] sm:$0x3]  ;;  %v336_v8 = vmov 0   ;;  %172 = vmatpush.msra.mxu0 %v152_v12 }
   0xe   :  { %v73_v2 = vshrl.u32 %v72_v0, 7  ;;  %64 = vst.msk [vmem:[#allocation3] sm:$0x3] %vm63_vm1, %v335_v1  ;;  %v130_v5 = vsel %vm129_vm2, %v69_v4, 0.0  ;;  %v71_v6 = vperm.slane %v69_v4, 0  ;;  %v84_v7 = vperm.slane %v69_v4, 1 }
   0xf   :  { %131 = vadd.xlane.f32.xlu0 %v130_v5  ;;  %v151_v13 = vld [vmem:[#allocation8 + $0x10] sm:$0xff]  ;;  %v150_v17 = vld [vmem:[#allocation8 + $0x8] sm:$0xff]  ;;  %v68_v20 = vld [vmem:[#allocation5 + $0x18] sm:$0xff]  ;;  %vm101_vm3 = vcmask 261120   ;;  %vm122_vm4 = vcmask 1041409   ;;  %s337_s13 = smov [#allocation10]  }
  0x10   :  { %v80_v3 = vadd.s32 8, %v73_v2  ;;  %239 = vset.pattern.permute.xlu0 %v73_v2  ;;  %173 = vmatpush.msra.mxu0 %v151_v13  ;;  %v66_v18 = vld [vmem:[#allocation5 + $0x8] sm:$0xff]  ;;  %v65_v23 = vld [vmem:[#allocation5] sm:$0xff]  ;;  %v67_v24 = vld [vmem:[#allocation5 + $0x10] sm:$0xff]  ;;  %s217_s14 = sshll.u32 %s337_s13, 4  ;;  %s219_s17 = sshll.u32 %s410_s6, 4  ;;  %s218_s14 = int_to_ptr.vmem [resolvable:$true] %s217_s14  ;;  %s220_s17 = int_to_ptr.hbm [resolvable:$true] %s219_s17 }
  0x11   :  { %v149_v51 = vld [vmem:[#allocation8] sm:$0xff]  ;;  %v245_v55 = vld [vmem:[%s407_s3] ss:$0 sm:$0xff] }
  0x12   :  { %240 = vset.pattern.permute.xlu1 %v80_v3  ;;  %242 = vset.pattern.permute.xlu2 %v80_v3 }
  0x13   :  { %174 = vmatpush.msra.mxu0 %v150_v17 }
  0x14   :  { %v70_v48 = vld [vmem:[#allocation2] sm:$0x3] }
  0x15   :  { %v128_v9 = vld [vmem:[#allocation3] sm:$0x3]  ;;  %175 = vmatpush.msra.mxu0 %v149_v51 }
  0x1a   :  { %82 = vperm.xlu1 %240, %v71_v6   ;;  %95 = vperm.xlu2 %242, %v84_v7  }
  0x22   :  { %241 = vset.pattern.permute.xlu1 %v73_v2  ;;  %243 = vset.pattern.permute.xlu2 %v336_v8 }
  0x23   :  { %76 = vperm.xlu0 %239, %v71_v6   ;;  %v246_v6 = vld [vmem:[%s408_s4] ss:$0 sm:$0xff] }
  0x2a   :  { %89 = vperm.xlu1 %241, %v84_v7  }
  0x2b   :  { %244 = vset.pattern.permute.xlu0 %v336_v8 }
  0x74   :  { %v96_v19 = vpop.permute.xlu2 %95 }
  0x75   :  { %v100_v22 = vmul.f32 %v96_v19, %v68_v20 }
  0x77   :  { %v112_v30 = vsel %vm101_vm3, %v100_v22, 0.0 }
  0x82   :  { %v132_v10 = vpop.xlane.xlu0 %131 }
  0x83   :  { %v133_v11 = vadd.f32 %v132_v10, %v128_v9 }
  0x85   :  { %135 = vst.msk [vmem:[#allocation3] sm:$0x3] %vm63_vm1, %v133_v11  ;;  %v209_v11 = vstv %s409_s5 }
  0x8c   :  { %v139_v14 = vld [vmem:[#allocation3] sm:$0x3]  ;;  %v83_v15 = vpop.permute.xlu1 %82 }
  0x8d   :  { %v140_v16 = vmax.f32 %v139_v14, 1.0  ;;  %v98_v21 = vmul.f32 %v83_v15, %v66_v18 }
  0x8f   :  { %247 = vrcp.f32 %v140_v16  ;;  %v103_v27 = vsel %vm101_vm3, %v98_v21, 0.0 }
  0x95   :  { %v248_v25 = vpop.eup %247  ;;  %v77_v26 = vpop.permute.xlu0 %76 }
  0x96   :  { %145 = vperm.xlu2 %243, %v248_v25   ;;  %v97_v29 = vmul.f32 %v77_v26, %v65_v23 }
  0x98   :  { %v102_v32 = vsel %vm101_vm3, %v97_v29, 0.0 }
  0x99   :  { %v104_v34 = vadd.f32 %v103_v27, %v102_v32 }
  0x9b   :  { %v105_v36 = vrot.slane %v104_v34, 4 }
  0x9c   :  { %v90_v28 = vpop.permute.xlu1 %89 }
  0x9d   :  { %v99_v31 = vmul.f32 %v90_v28, %v67_v24  ;;  %v106_v38 = vadd.f32 %v105_v36, %v104_v34 }
  0x9f   :  { %v111_v33 = vsel %vm101_vm3, %v99_v31, 0.0  ;;  %v107_v40 = vrot.slane %v106_v38, 2 }
  0xa0   :  { %v113_v35 = vadd.f32 %v112_v30, %v111_v33 }
  0xa1   :  { %v108_v42 = vadd.f32 %v107_v40, %v106_v38 }
  0xa2   :  { %v114_v37 = vrot.slane %v113_v35, 4 }
  0xa3   :  { %v109_v44 = vrot.slane %v108_v42, 1 }
  0xa4   :  { %v115_v39 = vadd.f32 %v114_v37, %v113_v35 }
  0xa5   :  { %v110_v46 = vadd.f32 %v109_v44, %v108_v42 }
  0xa6   :  { %v116_v41 = vrot.slane %v115_v39, 2 }
  0xa8   :  { %v117_v43 = vadd.f32 %v116_v41, %v115_v39 }
  0xaa   :  { %v118_v45 = vrot.slane %v117_v43, 1 }
  0xac   :  { %v119_v47 = vadd.f32 %v118_v45, %v117_v43 }
  0xae   :  { %v123_v49 = vsel %vm122_vm4, %v119_v47, %v110_v46 }
  0xaf   :  { %v125_v50 = vadd.f32 %v123_v49, %v70_v48 }
  0xb1   :  { %127 = vst.msk [vmem:[#allocation2] sm:$0x3] %vm61_vm0, %v125_v50 }
  0xb8   :  { %v141_v53 = vld [vmem:[#allocation2] sm:$0x3] }
  0xf0   :  { %v146_v52 = vpop.permute.xlu2 %145 }
  0xf1   :  { %v148_v54 = vmul.f32 %v146_v52, %v141_v53 }
  0xf3   :  { %230 = vmatmul.msk.f32.vlgmr.msra.gmra.mxu0 %vm101_vm3, %v148_v54 }
 0x170   :  { %v177_v56 = vpop.f32.mrf.mxu0 }
 0x171   :  { %v178_v57 = vadd.f32 %v245_v55, %v177_v56 }
 0x173   :  { %v231_v58 = vmul.f32 -1.442695, %v178_v57 }
 0x175   :  { %249 = vpow2.f32 %v231_v58 }
 0x17b   :  { %v250_v59 = vpop.eup %249 }
 0x17c   :  { %v183_v60 = vadd.f32 1.0, %v250_v59 }
 0x17e   :  { %251 = vrcp.f32 %v183_v60  ;;  %v195_v0 = vand.u32 2147483648, %v183_v60  ;;  %v193_v2 = vand.u32 2147483647, %v183_v60  ;;  %vm189_vm6 = vweird.f32 %v183_v60 }
 0x180   :  { %v196_v4 = vor.u32 1.1754944e-38, %v195_v0  ;;  %vm194_vm8 = vcmp.eq.f32.partialorder %v193_v2, 8.507059e+37 }
 0x184   :  { %v252_v61 = vpop.eup %251 }
 0x185   :  { %v185_v62 = vmul.f32 %v252_v61, %v183_v60  ;;  %vm190_vm5 = vweird.f32 %v252_v61 }
 0x186   :  { %vm191_vm7 = vmor %vm189_vm6, %vm190_vm5 }
 0x187   :  { %v186_v63 = vsub.f32 1.0, %v185_v62 }
 0x189   :  { %v187_v1 = vmul.f32 %v252_v61, %v186_v63 }
 0x18b   :  { %v188_v3 = vadd.f32 %v252_v61, %v187_v1 }
 0x18d   :  { %v192_v5 = vsel %vm191_vm7, %v252_v61, %v188_v3 }
 0x18e   :  { %v197_v7 = vsel %vm194_vm8, %v196_v4, %v192_v5 }
 0x18f   :  { %v199_v8 = vmul.f32 %v197_v7, %v178_v57 }
 0x191   :  { %v204_v9 = vmul.f32 %v246_v6, %v199_v8 }
 0x193   :  { %v205_v10 = vsel %vm61_vm0, %v204_v9, 0.0 }
 0x194   :  { %206 = vadd.xlane.f32.xlu1 %v205_v10 }
 0x207   :  { %v207_v12 = vpop.xlane.xlu1 %206 }
 0x208   :  { %v210_v13 = vadd.f32 %v209_v11, %v207_v12 }
 0x20a   :  { %211 = vst [vmem:[#allocation10] sm:$0x3] %v210_v13 }
 0x20b   :  { %222 = dma.vmem_to_hbm [thread:$0]  %s218_s14, 32, %s220_s17, [#allocation7]  }
 0x20c   :  { %329 = dma.done.wait [#allocation7], 32  }
 0x20d   :  { %330 = vsyncadd [#allocation7], 4294967264 }
 0x20e   :  { %227 = vsyncpa [#allocation6], 1 }
 0x20f   :  { %228 = vsyncpa [#allocation9], 1 }
 0x210   :  { %229 = vsyncpa [#allocation7], 1 }

</bundles_post_ra>
